<compile_context>
chip_gen: v5e
topology: v5e:2x2
jax: 0.10.0
libtpu: 0.0.40
codegen_flags: <defaults>
</compile_context>

<pallas_src>
import functools

import jax
import jax.numpy as jnp
import numpy as np
from jax.experimental import pallas as pl
from jax.experimental.pallas import tpu as pltpu

NU = 0.01 / np.pi
HIDDEN = 20
H_PAD = 24          # hidden dim zero-padded to a sublane multiple of 8
LANE = 128          # point-segment padding granularity (lane width)

# Row/lane offsets inside the packed (72, 24) parameter slab.
_ROW_W2 = 0         # rows  0..23 : W2^T (out, in), zero-padded to 24x24
_ROW_W3 = 24        # rows 24..47 : W3^T
_ROW_VEC = 48       # rows 48..71 : column-packed vectors (lanes below)
_PRM_ROWS = 72
_COL_W1X = 0        # W1 row multiplying x, as a (H_PAD, 1) column
_COL_W1T = 1        # W1 row multiplying t
_COL_B1 = 2
_COL_B2 = 3
_COL_B3 = 4
_COL_W4 = 5         # W4 column
_COL_B4 = 6         # scalar b4 stored at [_ROW_VEC, 6]


def _round_up(n, m):
    return ((n + m - 1) // m) * m


# -----------------------------------------------------------------------------
# Host-side packing helpers (run under jit as ordinary XLA ops).
# -----------------------------------------------------------------------------
def _pack_points(X_f, x0_t0, u0, xb_left_tb, xb_right_tb):
    """Pack all point batches into one (8, n_pts_pad) lane-dense slab.

    Rows: 0 = x, 1 = t, 2 = target, 3 = per-point scale (1/sqrt(N_segment),
    0 for padding columns), 4..7 = zero padding.  The collocation segment is
    padded to a multiple of 128 lanes and placed first; the remaining
    (IC + left boundary + right boundary) points form a second 128-aligned
    block, so every in-kernel slice boundary is lane-aligned.
    """
    n_f, n_0 = X_f.shape[0], x0_t0.shape[0]
    n_bl, n_br = xb_left_tb.shape[0], xb_right_tb.shape[0]
    n_rest = n_0 + n_bl + n_br
    n_f_pad = _round_up(n_f, LANE)
    n_rest_pad = _round_up(n_rest, LANE)
    n_pts_pad = n_f_pad + n_rest_pad

    rest_xy = jnp.concatenate([x0_t0, xb_left_tb, xb_right_tb],
                              axis=0).astype(jnp.float32)
    X_f = X_f.astype(jnp.float32)

    x_row = jnp.zeros((n_pts_pad,), jnp.float32)
    t_row = jnp.zeros((n_pts_pad,), jnp.float32)
    tgt_row = jnp.zeros((n_pts_pad,), jnp.float32)
    scl_row = jnp.zeros((n_pts_pad,), jnp.float32)

    x_row = x_row.at[0:n_f].set(X_f[:, 0])
    t_row = t_row.at[0:n_f].set(X_f[:, 1])
    x_row = x_row.at[n_f_pad:n_f_pad + n_rest].set(rest_xy[:, 0])
    t_row = t_row.at[n_f_pad:n_f_pad + n_rest].set(rest_xy[:, 1])

    tgt_row = tgt_row.at[n_f_pad:n_f_pad + n_0].set(
        u0.astype(jnp.float32)[:, 0])

    scl_row = scl_row.at[0:n_f].set(1.0 / np.sqrt(n_f))
    scl_row = scl_row.at[n_f_pad:n_f_pad + n_0].set(1.0 / np.sqrt(n_0))
    scl_row = scl_row.at[n_f_pad + n_0:n_f_pad + n_0 + n_bl].set(
        1.0 / np.sqrt(n_bl))
    scl_row = scl_row.at[n_f_pad + n_0 + n_bl:n_f_pad + n_rest].set(
        1.0 / np.sqrt(n_br))

    pts = jnp.zeros((8, n_pts_pad), jnp.float32)
    pts = pts.at[0, :].set(x_row)
    pts = pts.at[1, :].set(t_row)
    pts = pts.at[2, :].set(tgt_row)
    pts = pts.at[3, :].set(scl_row)
    return pts


def _pack_params(params):
    """Pack (W1t,b1,W2t,b2,W3t,b3,W4t,b4) into one (72, 24) f32 slab.

    W*t have (in, out) layout; they are stored transposed to (out, in) with
    zero padding to 24x24 so the in-kernel transposed-layout dots need no
    transpose.  All small vectors are stored as (H_PAD, 1) columns; padded
    rows/lanes are zero, which keeps the padded hidden units exactly inert.
    """
    W1, b1, W2, b2, W3, b3, W4, b4 = params
    slab = jnp.zeros((_PRM_ROWS, H_PAD), jnp.float32)
    slab = slab.at[_ROW_W2:_ROW_W2 + HIDDEN, 0:HIDDEN].set(W2.T)
    slab = slab.at[_ROW_W3:_ROW_W3 + HIDDEN, 0:HIDDEN].set(W3.T)
    slab = slab.at[_ROW_VEC:_ROW_VEC + HIDDEN, _COL_W1X].set(W1[0, :])
    slab = slab.at[_ROW_VEC:_ROW_VEC + HIDDEN, _COL_W1T].set(W1[1, :])
    slab = slab.at[_ROW_VEC:_ROW_VEC + HIDDEN, _COL_B1].set(b1[0, :])
    slab = slab.at[_ROW_VEC:_ROW_VEC + HIDDEN, _COL_B2].set(b2[0, :])
    slab = slab.at[_ROW_VEC:_ROW_VEC + HIDDEN, _COL_B3].set(b3[0, :])
    slab = slab.at[_ROW_VEC:_ROW_VEC + HIDDEN, _COL_W4].set(W4[:, 0])
    slab = slab.at[_ROW_VEC, _COL_B4].set(b4[0, 0])
    return slab


# -----------------------------------------------------------------------------
# Kernel
# -----------------------------------------------------------------------------
def _loss_pinn_kernel(pts_ref, prm_ref, out_ref, stk_ref, *,
                      n_f_pad, n_rest_pad):
    n_pts_pad = n_f_pad + n_rest_pad

    # Lane-dense point rows.
    x = pts_ref[0:1, :]                                 # (1, n_pts_pad)
    t = pts_ref[1:2, :]
    target = pts_ref[2:3, :]
    scale = pts_ref[3:4, :]

    # Static, aligned slices of the packed parameter slab (transposed layout).
    W2 = prm_ref[_ROW_W2:_ROW_W2 + H_PAD, :]            # (24, 24) = W2^T padded
    W3 = prm_ref[_ROW_W3:_ROW_W3 + H_PAD, :]            # (24, 24) = W3^T padded
    vec = prm_ref[_ROW_VEC:_ROW_VEC + H_PAD, :]         # (24, 24) column pack
    w1x = vec[:, _COL_W1X:_COL_W1X + 1]                 # (24, 1)
    w1t = vec[:, _COL_W1T:_COL_W1T + 1]
    b1 = vec[:, _COL_B1:_COL_B1 + 1]
    b2 = vec[:, _COL_B2:_COL_B2 + 1]
    b3 = vec[:, _COL_B3:_COL_B3 + 1]
    w4 = vec[:, _COL_W4:_COL_W4 + 1]
    b4 = vec[0:1, _COL_B4:_COL_B4 + 1]                  # (1, 1)

    # ---- layer 1: K=2 contraction via VPU broadcast FMAs (no MXU) ----------
    a1 = jnp.tanh(w1x * x + w1t * t + b1)               # (24, n_pts_pad)
    s1 = 1.0 - a1 * a1
    a1_f = a1[:, 0:n_f_pad]
    s1_f = s1[:, 0:n_f_pad]

    # Value chain (all points) + d/dx, d/dt, d2/dx2 chains (collocation only)
    # are stacked along lanes inside the persistent VMEM scratch so that every
    # subsequent layer is one wide matmul.
    stk_ref[:, 0:n_pts_pad] = a1
    stk_ref[:, n_pts_pad:n_pts_pad + n_f_pad] = s1_f * w1x
    stk_ref[:, n_pts_pad + n_f_pad:n_pts_pad + 2 * n_f_pad] = s1_f * w1t
    stk_ref[:, n_pts_pad + 2 * n_f_pad:n_pts_pad + 3 * n_f_pad] = (
        -2.0 * a1_f * s1_f * (w1x * w1x))               # d2z1/dx2 == 0

    def hidden_layer(W, b):
        S = stk_ref[...]                                 # (24, W_total)
        Z = jnp.dot(W, S, preferred_element_type=jnp.float32)
        a = jnp.tanh(Z[:, 0:n_pts_pad] + b)
        s = 1.0 - a * a
        a_f = a[:, 0:n_f_pad]
        s_f = s[:, 0:n_f_pad]
        zdx = Z[:, n_pts_pad:n_pts_pad + n_f_pad]
        zdt = Z[:, n_pts_pad + n_f_pad:n_pts_pad + 2 * n_f_pad]
        zdxx = Z[:, n_pts_pad + 2 * n_f_pad:n_pts_pad + 3 * n_f_pad]
        stk_ref[:, 0:n_pts_pad] = a
        stk_ref[:, n_pts_pad:n_pts_pad + n_f_pad] = s_f * zdx
        stk_ref[:, n_pts_pad + n_f_pad:n_pts_pad + 2 * n_f_pad] = s_f * zdt
        stk_ref[:, n_pts_pad + 2 * n_f_pad:n_pts_pad + 3 * n_f_pad] = (
            s_f * zdxx - 2.0 * a_f * s_f * (zdx * zdx))

    hidden_layer(W2, b2)
    hidden_layer(W3, b3)

    # ---- output layer: VPU broadcast-multiply + sublane reduce -------------
    S = stk_ref[...]
    O = jnp.sum(S * w4, axis=0, keepdims=True)           # (1, W_total)
    u_all = O[:, 0:n_pts_pad] + b4
    u_f = u_all[:, 0:n_f_pad]
    u_x = O[:, n_pts_pad:n_pts_pad + n_f_pad]
    u_t = O[:, n_pts_pad + n_f_pad:n_pts_pad + 2 * n_f_pad]
    u_xx = O[:, n_pts_pad + 2 * n_f_pad:n_pts_pad + 3 * n_f_pad]

    # Burgers PDE residual on the (real) collocation points.
    f = u_t + u_f * u_x - NU * u_xx

    # Mean denominators are folded into the 1/sqrt(N_seg) scale row; padding
    # columns carry scale=0 and therefore contribute nothing.
    r_f = f * scale[:, 0:n_f_pad]
    r_rest = (u_all[:, n_f_pad:n_pts_pad] - target[:, n_f_pad:n_pts_pad]) \
        * scale[:, n_f_pad:n_pts_pad]
    out_ref[0, 0] = jnp.sum(r_f * r_f) + jnp.sum(r_rest * r_rest)


# -----------------------------------------------------------------------------
# Wrapper
# -----------------------------------------------------------------------------
def loss_pinn(X_f, x0_t0, u0, xb_left_tb, xb_right_tb, params):
    """params: (W1t, b1, W2t, b2, W3t, b3, W4t, b4) with W*t = (in, out)."""
    n_f = X_f.shape[0]
    n_rest = x0_t0.shape[0] + xb_left_tb.shape[0] + xb_right_tb.shape[0]
    n_f_pad = _round_up(n_f, LANE)
    n_rest_pad = _round_up(n_rest, LANE)
    n_pts_pad = n_f_pad + n_rest_pad
    w_total = n_pts_pad + 3 * n_f_pad

    pts = _pack_points(X_f, x0_t0, u0, xb_left_tb, xb_right_tb)
    prm = _pack_params(params)

    kernel = functools.partial(
        _loss_pinn_kernel, n_f_pad=n_f_pad, n_rest_pad=n_rest_pad)

    # TODO(synk): for realistic PINN sizes (>=1e4 collocation points) add a
    # grid over the lane (point) axis with 2048-8192-point blocks, pin the
    # (72, 24) param slab with an index_map returning (0, 0), accumulate the
    # scalar loss with pl.when init/finalize and generation-dependent block
    # sizes (v7x has only 64 MiB VMEM / 2 TCs; v5e/v6e can use larger blocks
    # via vmem_limit_bytes).  At the current tiny sizes per-step grid overhead
    # would dominate, so stay gridless.
    out = pl.pallas_call(
        kernel,
        out_shape=jax.ShapeDtypeStruct((1, 1), jnp.float32),
        in_specs=[pl.BlockSpec(memory_space=pltpu.MemorySpace.VMEM),
                  pl.BlockSpec(memory_space=pltpu.MemorySpace.VMEM)],
        out_specs=pl.BlockSpec(memory_space=pltpu.MemorySpace.SMEM),
        scratch_shapes=[pltpu.VMEM((H_PAD, w_total), jnp.float32)],
    )(pts, prm)
    return out[0, 0]


# -----------------------------------------------------------------------------
# Reference (pure JAX autodiff) and parameter init
# -----------------------------------------------------------------------------
def _reference_loss(X_f, x0_t0, u0, xb_left_tb, xb_right_tb, params):
    W1, b1, W2, b2, W3, b3, W4, b4 = params
    hi = jax.lax.Precision.HIGHEST

    def net(X):
        a = jnp.tanh(jnp.dot(X, W1, precision=hi) + b1)
        a = jnp.tanh(jnp.dot(a, W2, precision=hi) + b2)
        a = jnp.tanh(jnp.dot(a, W3, precision=hi) + b3)
        return jnp.dot(a, W4, precision=hi) + b4

    def u_scalar(xt):
        return net(xt[None, :])[0, 0]

    u_f = net(X_f)
    g = jax.vmap(jax.grad(u_scalar))(X_f)
    u_x, u_t = g[:, 0:1], g[:, 1:2]
    u_xx = jax.vmap(lambda xt: jax.hessian(u_scalar)(xt)[0, 0])(X_f)[:, None]
    f = u_t + u_f * u_x - NU * u_xx
    loss_f = jnp.mean(f ** 2)
    loss_0 = jnp.mean((net(x0_t0) - u0) ** 2)
    loss_b = jnp.mean(net(xb_left_tb) ** 2) + jnp.mean(net(xb_right_tb) ** 2)
    return loss_f + loss_0 + loss_b


def init_params(key):
    """Deterministic synthetic init of the InferenceNet parameters.

    Shapes follow nn.Linear(2,20), (20,20), (20,20), (20,1); weights are
    returned pre-transposed to (in_features, out_features)."""
    dims = [(2, HIDDEN), (HIDDEN, HIDDEN), (HIDDEN, HIDDEN), (HIDDEN, 1)]
    params = []
    for (fan_in, fan_out) in dims:
        key, kw, kb = jax.random.split(key, 3)
        bound = 1.0 / np.sqrt(fan_in)
        Wt = jax.random.uniform(kw, (fan_in, fan_out), jnp.float32, -bound, bound)
        b = jax.random.uniform(kb, (1, fan_out), jnp.float32, -bound, bound)
        params += [Wt, b]
    return tuple(params)


if __name__ == "__main__":
    key = jax.random.PRNGKey(0)
    k_xf, k_x0, k_bl, k_br, k_params = jax.random.split(key, 5)

    N_F, N_0, N_B = 64, 32, 16
    # collocation points (x, t)
    X_f = jax.random.uniform(k_xf, (N_F, 2), jnp.float32, -1.0, 1.0)
    # initial condition points (t = 0)
    x0 = jax.random.uniform(k_x0, (N_0, 1), jnp.float32, -1.0, 1.0)
    x0_t0 = jnp.concatenate([x0, jnp.zeros_like(x0)], axis=1)
    u0 = -jnp.sin(np.pi * x0)
    # boundary points (x = -1 and x = +1)
    tb1 = jax.random.uniform(k_bl, (N_B, 1), jnp.float32, 0.0, 1.0)
    xb_left_tb = jnp.concatenate([-jnp.ones_like(tb1), tb1], axis=1)
    tb2 = jax.random.uniform(k_br, (N_B, 1), jnp.float32, 0.0, 1.0)
    xb_right_tb = jnp.concatenate([jnp.ones_like(tb2), tb2], axis=1)

    params = init_params(k_params)

    loss = jax.jit(loss_pinn)(X_f, x0_t0, u0, xb_left_tb, xb_right_tb, params)
    loss = jax.block_until_ready(loss)

    ref = jax.jit(_reference_loss)(X_f, x0_t0, u0, xb_left_tb, xb_right_tb, params)
    ref = jax.block_until_ready(ref)

    assert jnp.isfinite(loss)
    assert jnp.allclose(loss, ref, rtol=5e-3, atol=1e-4), (float(loss), float(ref))
    print("KERNEL_OK")
</pallas_src>

<mosaic_0001>
module attributes {stable_mosaic.version = 11 : i64} {
  func.func @_loss_pinn_kernel(%arg0: memref<8x256xf32, #tpu.memory_space<vmem>>, %arg1: memref<72x24xf32, #tpu.memory_space<vmem>>, %arg2: memref<1x1xf32, #tpu.memory_space<smem>>, %arg3: memref<24x640xf32, #tpu.memory_space<vmem>>) attributes {dimension_semantics = [], scalar_prefetch = 0 : i64, scratch_operands = 1 : i64, tpu.core_type = #tpu.core_type<tc>} {
    %c0 = arith.constant 0 : index
    %c0_0 = arith.constant 0 : index
    %0 = vector.load %arg0[%c0, %c0_0] : memref<8x256xf32, #tpu.memory_space<vmem>>, vector<1x256xf32>
    %c1 = arith.constant 1 : index
    %c0_1 = arith.constant 0 : index
    %1 = vector.load %arg0[%c1, %c0_1] : memref<8x256xf32, #tpu.memory_space<vmem>>, vector<1x256xf32>
    %c2 = arith.constant 2 : index
    %c0_2 = arith.constant 0 : index
    %2 = vector.load %arg0[%c2, %c0_2] : memref<8x256xf32, #tpu.memory_space<vmem>>, vector<1x256xf32>
    %c3 = arith.constant 3 : index
    %c0_3 = arith.constant 0 : index
    %3 = vector.load %arg0[%c3, %c0_3] : memref<8x256xf32, #tpu.memory_space<vmem>>, vector<1x256xf32>
    %c0_4 = arith.constant 0 : index
    %c0_5 = arith.constant 0 : index
    %4 = vector.load %arg1[%c0_4, %c0_5] : memref<72x24xf32, #tpu.memory_space<vmem>>, vector<24x24xf32>
    %c24 = arith.constant 24 : index
    %c0_6 = arith.constant 0 : index
    %5 = vector.load %arg1[%c24, %c0_6] : memref<72x24xf32, #tpu.memory_space<vmem>>, vector<24x24xf32>
    %c48 = arith.constant 48 : index
    %c0_7 = arith.constant 0 : index
    %6 = vector.load %arg1[%c48, %c0_7] : memref<72x24xf32, #tpu.memory_space<vmem>>, vector<24x24xf32>
    %7 = vector.extract_strided_slice %6 {offsets = [0, 0], sizes = [24, 1], strides = [1, 1]} : vector<24x24xf32> to vector<24x1xf32>
    %8 = vector.extract_strided_slice %6 {offsets = [0, 1], sizes = [24, 1], strides = [1, 1]} : vector<24x24xf32> to vector<24x1xf32>
    %9 = vector.extract_strided_slice %6 {offsets = [0, 2], sizes = [24, 1], strides = [1, 1]} : vector<24x24xf32> to vector<24x1xf32>
    %10 = vector.extract_strided_slice %6 {offsets = [0, 3], sizes = [24, 1], strides = [1, 1]} : vector<24x24xf32> to vector<24x1xf32>
    %11 = vector.extract_strided_slice %6 {offsets = [0, 4], sizes = [24, 1], strides = [1, 1]} : vector<24x24xf32> to vector<24x1xf32>
    %12 = vector.extract_strided_slice %6 {offsets = [0, 5], sizes = [24, 1], strides = [1, 1]} : vector<24x24xf32> to vector<24x1xf32>
    %13 = vector.extract_strided_slice %6 {offsets = [0, 6], sizes = [1, 1], strides = [1, 1]} : vector<24x24xf32> to vector<1x1xf32>
    %14 = vector.broadcast %7 : vector<24x1xf32> to vector<24x256xf32>
    %15 = vector.broadcast %0 : vector<1x256xf32> to vector<24x256xf32>
    %16 = arith.mulf %14, %15 : vector<24x256xf32>
    %17 = vector.broadcast %8 : vector<24x1xf32> to vector<24x256xf32>
    %18 = vector.broadcast %1 : vector<1x256xf32> to vector<24x256xf32>
    %19 = arith.mulf %17, %18 : vector<24x256xf32>
    %20 = arith.addf %16, %19 : vector<24x256xf32>
    %21 = vector.broadcast %9 : vector<24x1xf32> to vector<24x256xf32>
    %22 = arith.addf %20, %21 : vector<24x256xf32>
    %23 = math.tanh %22 : vector<24x256xf32>
    %24 = arith.mulf %23, %23 : vector<24x256xf32>
    %cst = arith.constant 1.000000e+00 : f32
    %25 = vector.broadcast %cst : f32 to vector<24x256xf32>
    %26 = arith.subf %25, %24 : vector<24x256xf32>
    %27 = vector.extract_strided_slice %23 {offsets = [0, 0], sizes = [24, 128], strides = [1, 1]} : vector<24x256xf32> to vector<24x128xf32>
    %28 = vector.extract_strided_slice %26 {offsets = [0, 0], sizes = [24, 128], strides = [1, 1]} : vector<24x256xf32> to vector<24x128xf32>
    %c0_8 = arith.constant 0 : index
    %c0_9 = arith.constant 0 : index
    %29 = vector.load %arg3[%c0_8, %c0_9] : memref<24x640xf32, #tpu.memory_space<vmem>>, vector<24x256xf32>
    tpu.vector_store %arg3[%c0_8, %c0_9], %23 {strides = array<i32>} : memref<24x640xf32, #tpu.memory_space<vmem>>, vector<24x256xf32>,
    %30 = vector.broadcast %7 : vector<24x1xf32> to vector<24x128xf32>
    %31 = arith.mulf %28, %30 : vector<24x128xf32>
    %c0_10 = arith.constant 0 : index
    %c256 = arith.constant 256 : index
    %32 = vector.load %arg3[%c0_10, %c256] : memref<24x640xf32, #tpu.memory_space<vmem>>, vector<24x128xf32>
    tpu.vector_store %arg3[%c0_10, %c256], %31 {strides = array<i32>} : memref<24x640xf32, #tpu.memory_space<vmem>>, vector<24x128xf32>,
    %33 = vector.broadcast %8 : vector<24x1xf32> to vector<24x128xf32>
    %34 = arith.mulf %28, %33 : vector<24x128xf32>
    %c0_11 = arith.constant 0 : index
    %c384 = arith.constant 384 : index
    %35 = vector.load %arg3[%c0_11, %c384] : memref<24x640xf32, #tpu.memory_space<vmem>>, vector<24x128xf32>
    tpu.vector_store %arg3[%c0_11, %c384], %34 {strides = array<i32>} : memref<24x640xf32, #tpu.memory_space<vmem>>, vector<24x128xf32>,
    %cst_12 = arith.constant -2.000000e+00 : f32
    %36 = vector.broadcast %cst_12 : f32 to vector<24x128xf32>
    %37 = arith.mulf %36, %27 : vector<24x128xf32>
    %38 = arith.mulf %37, %28 : vector<24x128xf32>
    %39 = arith.mulf %7, %7 : vector<24x1xf32>
    %40 = vector.broadcast %39 : vector<24x1xf32> to vector<24x128xf32>
    %41 = arith.mulf %38, %40 : vector<24x128xf32>
    %c0_13 = arith.constant 0 : index
    %c512 = arith.constant 512 : index
    %42 = vector.load %arg3[%c0_13, %c512] : memref<24x640xf32, #tpu.memory_space<vmem>>, vector<24x128xf32>
    tpu.vector_store %arg3[%c0_13, %c512], %41 {strides = array<i32>} : memref<24x640xf32, #tpu.memory_space<vmem>>, vector<24x128xf32>,
    %c0_14 = arith.constant 0 : index
    %c0_15 = arith.constant 0 : index
    %43 = vector.load %arg3[%c0_14, %c0_15] : memref<24x640xf32, #tpu.memory_space<vmem>>, vector<24x640xf32>
    %cst_16 = arith.constant dense<0.000000e+00> : vector<24x640xf32>
    %44 = tpu.matmul %4, %43, %cst_16 {dimension_numbers = #tpu.dot_dimension_numbers<[1], [0], [0], [1], [0, 0, 1, 1], [], []>} : vector<24x24xf32>, vector<24x640xf32>, vector<24x640xf32> -> vector<24x640xf32>
    %45 = vector.extract_strided_slice %44 {offsets = [0, 0], sizes = [24, 256], strides = [1, 1]} : vector<24x640xf32> to vector<24x256xf32>
    %46 = vector.broadcast %10 : vector<24x1xf32> to vector<24x256xf32>
    %47 = arith.addf %45, %46 : vector<24x256xf32>
    %48 = math.tanh %47 : vector<24x256xf32>
    %49 = arith.mulf %48, %48 : vector<24x256xf32>
    %cst_17 = arith.constant 1.000000e+00 : f32
    %50 = vector.broadcast %cst_17 : f32 to vector<24x256xf32>
    %51 = arith.subf %50, %49 : vector<24x256xf32>
    %52 = vector.extract_strided_slice %48 {offsets = [0, 0], sizes = [24, 128], strides = [1, 1]} : vector<24x256xf32> to vector<24x128xf32>
    %53 = vector.extract_strided_slice %51 {offsets = [0, 0], sizes = [24, 128], strides = [1, 1]} : vector<24x256xf32> to vector<24x128xf32>
    %54 = vector.extract_strided_slice %44 {offsets = [0, 256], sizes = [24, 128], strides = [1, 1]} : vector<24x640xf32> to vector<24x128xf32>
    %55 = vector.extract_strided_slice %44 {offsets = [0, 384], sizes = [24, 128], strides = [1, 1]} : vector<24x640xf32> to vector<24x128xf32>
    %56 = vector.extract_strided_slice %44 {offsets = [0, 512], sizes = [24, 128], strides = [1, 1]} : vector<24x640xf32> to vector<24x128xf32>
    %c0_18 = arith.constant 0 : index
    %c0_19 = arith.constant 0 : index
    %57 = vector.load %arg3[%c0_18, %c0_19] : memref<24x640xf32, #tpu.memory_space<vmem>>, vector<24x256xf32>
    tpu.vector_store %arg3[%c0_18, %c0_19], %48 {strides = array<i32>} : memref<24x640xf32, #tpu.memory_space<vmem>>, vector<24x256xf32>,
    %58 = arith.mulf %53, %54 : vector<24x128xf32>
    %c0_20 = arith.constant 0 : index
    %c256_21 = arith.constant 256 : index
    %59 = vector.load %arg3[%c0_20, %c256_21] : memref<24x640xf32, #tpu.memory_space<vmem>>, vector<24x128xf32>
    tpu.vector_store %arg3[%c0_20, %c256_21], %58 {strides = array<i32>} : memref<24x640xf32, #tpu.memory_space<vmem>>, vector<24x128xf32>,
    %60 = arith.mulf %53, %55 : vector<24x128xf32>
    %c0_22 = arith.constant 0 : index
    %c384_23 = arith.constant 384 : index
    %61 = vector.load %arg3[%c0_22, %c384_23] : memref<24x640xf32, #tpu.memory_space<vmem>>, vector<24x128xf32>
    tpu.vector_store %arg3[%c0_22, %c384_23], %60 {strides = array<i32>} : memref<24x640xf32, #tpu.memory_space<vmem>>, vector<24x128xf32>,
    %62 = arith.mulf %53, %56 : vector<24x128xf32>
    %cst_24 = arith.constant 2.000000e+00 : f32
    %63 = vector.broadcast %cst_24 : f32 to vector<24x128xf32>
    %64 = arith.mulf %63, %52 : vector<24x128xf32>
    %65 = arith.mulf %64, %53 : vector<24x128xf32>
    %66 = arith.mulf %54, %54 : vector<24x128xf32>
    %67 = arith.mulf %65, %66 : vector<24x128xf32>
    %68 = arith.subf %62, %67 : vector<24x128xf32>
    %c0_25 = arith.constant 0 : index
    %c512_26 = arith.constant 512 : index
    %69 = vector.load %arg3[%c0_25, %c512_26] : memref<24x640xf32, #tpu.memory_space<vmem>>, vector<24x128xf32>
    tpu.vector_store %arg3[%c0_25, %c512_26], %68 {strides = array<i32>} : memref<24x640xf32, #tpu.memory_space<vmem>>, vector<24x128xf32>,
    %c0_27 = arith.constant 0 : index
    %c0_28 = arith.constant 0 : index
    %70 = vector.load %arg3[%c0_27, %c0_28] : memref<24x640xf32, #tpu.memory_space<vmem>>, vector<24x640xf32>
    %cst_29 = arith.constant dense<0.000000e+00> : vector<24x640xf32>
    %71 = tpu.matmul %5, %70, %cst_29 {dimension_numbers = #tpu.dot_dimension_numbers<[1], [0], [0], [1], [0, 0, 1, 1], [], []>} : vector<24x24xf32>, vector<24x640xf32>, vector<24x640xf32> -> vector<24x640xf32>
    %72 = vector.extract_strided_slice %71 {offsets = [0, 0], sizes = [24, 256], strides = [1, 1]} : vector<24x640xf32> to vector<24x256xf32>
    %73 = vector.broadcast %11 : vector<24x1xf32> to vector<24x256xf32>
    %74 = arith.addf %72, %73 : vector<24x256xf32>
    %75 = math.tanh %74 : vector<24x256xf32>
    %76 = arith.mulf %75, %75 : vector<24x256xf32>
    %cst_30 = arith.constant 1.000000e+00 : f32
    %77 = vector.broadcast %cst_30 : f32 to vector<24x256xf32>
    %78 = arith.subf %77, %76 : vector<24x256xf32>
    %79 = vector.extract_strided_slice %75 {offsets = [0, 0], sizes = [24, 128], strides = [1, 1]} : vector<24x256xf32> to vector<24x128xf32>
    %80 = vector.extract_strided_slice %78 {offsets = [0, 0], sizes = [24, 128], strides = [1, 1]} : vector<24x256xf32> to vector<24x128xf32>
    %81 = vector.extract_strided_slice %71 {offsets = [0, 256], sizes = [24, 128], strides = [1, 1]} : vector<24x640xf32> to vector<24x128xf32>
    %82 = vector.extract_strided_slice %71 {offsets = [0, 384], sizes = [24, 128], strides = [1, 1]} : vector<24x640xf32> to vector<24x128xf32>
    %83 = vector.extract_strided_slice %71 {offsets = [0, 512], sizes = [24, 128], strides = [1, 1]} : vector<24x640xf32> to vector<24x128xf32>
    %c0_31 = arith.constant 0 : index
    %c0_32 = arith.constant 0 : index
    %84 = vector.load %arg3[%c0_31, %c0_32] : memref<24x640xf32, #tpu.memory_space<vmem>>, vector<24x256xf32>
    tpu.vector_store %arg3[%c0_31, %c0_32], %75 {strides = array<i32>} : memref<24x640xf32, #tpu.memory_space<vmem>>, vector<24x256xf32>,
    %85 = arith.mulf %80, %81 : vector<24x128xf32>
    %c0_33 = arith.constant 0 : index
    %c256_34 = arith.constant 256 : index
    %86 = vector.load %arg3[%c0_33, %c256_34] : memref<24x640xf32, #tpu.memory_space<vmem>>, vector<24x128xf32>
    tpu.vector_store %arg3[%c0_33, %c256_34], %85 {strides = array<i32>} : memref<24x640xf32, #tpu.memory_space<vmem>>, vector<24x128xf32>,
    %87 = arith.mulf %80, %82 : vector<24x128xf32>
    %c0_35 = arith.constant 0 : index
    %c384_36 = arith.constant 384 : index
    %88 = vector.load %arg3[%c0_35, %c384_36] : memref<24x640xf32, #tpu.memory_space<vmem>>, vector<24x128xf32>
    tpu.vector_store %arg3[%c0_35, %c384_36], %87 {strides = array<i32>} : memref<24x640xf32, #tpu.memory_space<vmem>>, vector<24x128xf32>,
    %89 = arith.mulf %80, %83 : vector<24x128xf32>
    %cst_37 = arith.constant 2.000000e+00 : f32
    %90 = vector.broadcast %cst_37 : f32 to vector<24x128xf32>
    %91 = arith.mulf %90, %79 : vector<24x128xf32>
    %92 = arith.mulf %91, %80 : vector<24x128xf32>
    %93 = arith.mulf %81, %81 : vector<24x128xf32>
    %94 = arith.mulf %92, %93 : vector<24x128xf32>
    %95 = arith.subf %89, %94 : vector<24x128xf32>
    %c0_38 = arith.constant 0 : index
    %c512_39 = arith.constant 512 : index
    %96 = vector.load %arg3[%c0_38, %c512_39] : memref<24x640xf32, #tpu.memory_space<vmem>>, vector<24x128xf32>
    tpu.vector_store %arg3[%c0_38, %c512_39], %95 {strides = array<i32>} : memref<24x640xf32, #tpu.memory_space<vmem>>, vector<24x128xf32>,
    %c0_40 = arith.constant 0 : index
    %c0_41 = arith.constant 0 : index
    %97 = vector.load %arg3[%c0_40, %c0_41] : memref<24x640xf32, #tpu.memory_space<vmem>>, vector<24x640xf32>
    %98 = vector.broadcast %12 : vector<24x1xf32> to vector<24x640xf32>
    %99 = arith.mulf %97, %98 : vector<24x640xf32>
    %cst_42 = arith.constant dense<0.000000e+00> : vector<640xf32>
    %100 = vector.multi_reduction <add>, %99, %cst_42 [0] : vector<24x640xf32> to vector<640xf32>
    %101 = vector.shape_cast %100 : vector<640xf32> to vector<1x640xf32>
    %102 = vector.extract_strided_slice %101 {offsets = [0, 0], sizes = [1, 256], strides = [1, 1]} : vector<1x640xf32> to vector<1x256xf32>
    %103 = vector.broadcast %13 : vector<1x1xf32> to vector<1x256xf32>
    %104 = arith.addf %102, %103 : vector<1x256xf32>
    %105 = vector.extract_strided_slice %104 {offsets = [0, 0], sizes = [1, 128], strides = [1, 1]} : vector<1x256xf32> to vector<1x128xf32>
    %106 = vector.extract_strided_slice %101 {offsets = [0, 256], sizes = [1, 128], strides = [1, 1]} : vector<1x640xf32> to vector<1x128xf32>
    %107 = vector.extract_strided_slice %101 {offsets = [0, 384], sizes = [1, 128], strides = [1, 1]} : vector<1x640xf32> to vector<1x128xf32>
    %108 = vector.extract_strided_slice %101 {offsets = [0, 512], sizes = [1, 128], strides = [1, 1]} : vector<1x640xf32> to vector<1x128xf32>
    %109 = arith.mulf %105, %106 : vector<1x128xf32>
    %110 = arith.addf %107, %109 : vector<1x128xf32>
    %cst_43 = arith.constant 0.00318309898 : f32
    %111 = vector.broadcast %cst_43 : f32 to vector<1x128xf32>
    %112 = arith.mulf %111, %108 : vector<1x128xf32>
    %113 = arith.subf %110, %112 : vector<1x128xf32>
    %114 = vector.extract_strided_slice %3 {offsets = [0, 0], sizes = [1, 128], strides = [1, 1]} : vector<1x256xf32> to vector<1x128xf32>
    %115 = arith.mulf %113, %114 : vector<1x128xf32>
    %116 = vector.extract_strided_slice %104 {offsets = [0, 128], sizes = [1, 128], strides = [1, 1]} : vector<1x256xf32> to vector<1x128xf32>
    %117 = vector.extract_strided_slice %2 {offsets = [0, 128], sizes = [1, 128], strides = [1, 1]} : vector<1x256xf32> to vector<1x128xf32>
    %118 = arith.subf %116, %117 : vector<1x128xf32>
    %119 = vector.extract_strided_slice %3 {offsets = [0, 128], sizes = [1, 128], strides = [1, 1]} : vector<1x256xf32> to vector<1x128xf32>
    %120 = arith.mulf %118, %119 : vector<1x128xf32>
    %121 = arith.mulf %115, %115 : vector<1x128xf32>
    %122 = vector.shape_cast %121 : vector<1x128xf32> to vector<1x1x128xf32>
    %cst_44 = arith.constant dense<0.000000e+00> : vector<1xf32>
    %123 = vector.multi_reduction <add>, %122, %cst_44 [1, 2] : vector<1x1x128xf32> to vector<1xf32>
    %124 = vector.shape_cast %123 : vector<1xf32> to vector<1x1x1xf32>
    %125 = vector.extract %124[0, 0, 0] : f32 from vector<1x1x1xf32>
    %126 = arith.mulf %120, %120 : vector<1x128xf32>
    %127 = vector.shape_cast %126 : vector<1x128xf32> to vector<1x1x128xf32>
    %cst_45 = arith.constant dense<0.000000e+00> : vector<1xf32>
    %128 = vector.multi_reduction <add>, %127, %cst_45 [1, 2] : vector<1x1x128xf32> to vector<1xf32>
    %129 = vector.shape_cast %128 : vector<1xf32> to vector<1x1x1xf32>
    %130 = vector.extract %129[0, 0, 0] : f32 from vector<1x1x1xf32>
    %131 = arith.addf %125, %130 : f32
    %c0_46 = arith.constant 0 : index
    %c0_47 = arith.constant 0 : index
    %132 = memref.load %arg2[%c0_46, %c0_47] : memref<1x1xf32, #tpu.memory_space<smem>>
    memref.store %131, %arg2[%c0_46, %c0_47] : memref<1x1xf32, #tpu.memory_space<smem>>
    return
  }
}

</mosaic_0001>

<bundles_post_ra>
// kernel: loss_pinn.1
= control target key start
LH: loop header
LB: loop body
LE: loop exit
PB: predicated region body
PF: predicated region fallthrough
CT: control target
= control target key end

     0   :  { %v872_v2 = vmov 0   ;;  %s1064_s0 = inlined_call_operand.vmem [shape: f32[8,256], index: 0, kind: input, shape index: {}]   ;;  %s1065_s1 = inlined_call_operand.vmem [shape: f32[72,24], index: 1, kind: input, shape index: {}]   ;;  %s1066_s2 = inlined_call_operand.hbm [shape: f32[1,1], index: 2, kind: output, shape index: {}]  }
   0x1   :  { %v898_v0 = vld [vmem:[%s1065_s1 + $0x40] sm:$0xff]  ;;  %v903_v1 = vld [vmem:[%s1065_s1 + $0x38] sm:$0xff]  ;;  %803 = vset.pattern.permute.xlu1 %v872_v2  ;;  %801 = vset.pattern.permute.xlu0 %v872_v2  ;;  %v908_v3 = vld [vmem:[%s1065_s1 + $0x30] sm:$0xff] }
   0x2   :  { %7 = vsyncpa [#allocation4], 0  ;;  %40 = vperm.xlu0 %801, %v898_v0   ;;  %35 = vperm.xlu1 %803, %v903_v1   ;;  %v873_v4 = vmov 1   ;;  %v874_v5 = vmov 2   ;;  %v139_v6 = vmul.f32 %v898_v0, %v898_v0  ;;  %v138_v7 = vmul.f32 %v903_v1, %v903_v1  ;;  %v20_v61 = vld [vmem:[%s1065_s1 + $0x8] sm:$0xff]  ;;  %s740_s7 = sshll.u32 %s1066_s2, 4  ;;  %s741_s7 = int_to_ptr.hbm [resolvable:$true] %s740_s7 }
   0x3   :  { %805 = vset.pattern.permute.xlu2 %v872_v2  ;;  %v137_v8 = vmul.f32 %v908_v3, %v908_v3  ;;  %v12_v12 = vld [vmem:[%s1064_s0] ss:$8 sm:$0x3]  ;;  %v750_v14 = vld [vmem:[%s1064_s0 + $0x1] ss:$8 sm:$0x3] }
   0x4   :  { %30 = vperm.xlu2 %805, %v908_v3   ;;  %v44_v15 = vperm.slane %v12_v12, 0  ;;  %v67_v16 = vperm.slane %v750_v14, 0  ;;  %v45_v19 = vperm.slane %v12_v12, 1  ;;  %v68_v21 = vperm.slane %v750_v14, 1  ;;  %s879_s11 = smov [#allocation3]  }
   0x5   :  { %v875_v32 = vmov 3   ;;  %vm176_vm0 = vcmask 195584   ;;  %vm710_vm1 = vcmask 1040384  }
   0xa   :  { %802 = vset.pattern.permute.xlu0 %v873_v4  ;;  %804 = vset.pattern.permute.xlu1 %v873_v4 }
   0xb   :  { %63 = vperm.xlu0 %802, %v898_v0   ;;  %59 = vperm.xlu1 %804, %v903_v1  }
   0xc   :  { %806 = vset.pattern.permute.xlu2 %v873_v4 }
   0xd   :  { %55 = vperm.xlu2 %806, %v908_v3  }
  0x13   :  { %809 = vset.pattern.permute.xlu0 %v874_v5  ;;  %807 = vset.pattern.permute.xlu1 %v874_v5 }
  0x14   :  { %92 = vperm.xlu1 %807, %v898_v0   ;;  %84 = vperm.xlu0 %809, %v908_v3  }
  0x15   :  { %808 = vset.pattern.permute.xlu2 %v874_v5 }
  0x16   :  { %88 = vperm.xlu2 %808, %v903_v1  }
  0x1c   :  { %810 = vset.pattern.permute.xlu1 %v872_v2  ;;  %813 = vset.pattern.permute.xlu0 %v875_v32 }
  0x1d   :  { %152 = vperm.xlu1 %810, %v139_v6   ;;  %321 = vperm.xlu0 %813, %v903_v1  }
  0x1e   :  { %811 = vset.pattern.permute.xlu2 %v872_v2 }
  0x1f   :  { %147 = vperm.xlu2 %811, %v138_v7   ;;  %v19_v7 = vld [vmem:[%s1065_s1] sm:$0xff] }
  0x25   :  { %142 = vperm.xlu1 %810, %v137_v8  }
  0x27   :  { %812 = vset.pattern.permute.xlu2 %v875_v32 }
  0x28   :  { %325 = vperm.xlu2 %812, %v898_v0  }
  0x2d   :  { %814 = vset.pattern.permute.xlu1 %v875_v32 }
  0x2e   :  { %317 = vperm.xlu1 %814, %v908_v3  }
  0x5e   :  { %v925_v9 = vpop.permute.xlu2 %30 }
  0x5f   :  { %v48_v24 = vmul.f32 %v44_v15, %v925_v9  ;;  %v49_v35 = vmul.f32 %v45_v19, %v925_v9 }
  0x67   :  { %v934_v13 = vpop.permute.xlu2 %55 }
  0x68   :  { %v71_v27 = vmul.f32 %v67_v16, %v934_v13  ;;  %v72_v36 = vmul.f32 %v68_v21, %v934_v13 }
  0x6a   :  { %v77_v40 = vadd.f32 %v71_v27, %v48_v24  ;;  %v78_v47 = vadd.f32 %v72_v36, %v49_v35 }
  0x70   :  { %v89_v23 = vpop.permute.xlu2 %88 }
  0x74   :  { %v927_v10 = vpop.permute.xlu1 %35  ;;  %v929_v11 = vpop.permute.xlu0 %40 }
  0x75   :  { %v50_v20 = vmul.f32 %v44_v15, %v927_v10  ;;  %v51_v30 = vmul.f32 %v45_v19, %v927_v10  ;;  %v52_v33 = vmul.f32 %v44_v15, %v929_v11  ;;  %v53_v34 = vmul.f32 %v45_v19, %v929_v11 }
  0x79   :  { %v148_v14 = vpop.permute.xlu2 %147 }
  0x7d   :  { %v939_v17 = vpop.permute.xlu0 %63  ;;  %v941_v18 = vpop.permute.xlu1 %59 }
  0x7e   :  { %v73_v22 = vmul.f32 %v67_v16, %v941_v18  ;;  %v74_v25 = vmul.f32 %v68_v21, %v941_v18  ;;  %v75_v28 = vmul.f32 %v67_v16, %v939_v17  ;;  %v76_v29 = vmul.f32 %v68_v21, %v939_v17 }
  0x80   :  { %v79_v26 = vadd.f32 %v73_v22, %v50_v20  ;;  %v80_v37 = vadd.f32 %v74_v25, %v51_v30  ;;  %v81_v38 = vadd.f32 %v75_v28, %v52_v33  ;;  %v82_v39 = vadd.f32 %v76_v29, %v53_v34 }
  0x82   :  { %v97_v31 = vadd.f32 %v89_v23, %v79_v26  ;;  %v98_v46 = vadd.f32 %v89_v23, %v80_v37  ;;  %v326_v26 = vpop.permute.xlu2 %325  ;;  %v876_v37 = vmov 4  }
  0x83   :  { %816 = vset.pattern.permute.xlu1 %v876_v37  ;;  %815 = vset.pattern.permute.xlu2 %v876_v37 }
  0x84   :  { %822 = vtanh.f32 %v97_v31  ;;  %544 = vperm.xlu1 %816, %v903_v1   ;;  %540 = vperm.xlu2 %815, %v908_v3  }
  0x86   :  { %v93_v41 = vpop.permute.xlu1 %92  ;;  %v85_v42 = vpop.permute.xlu0 %84 }
  0x87   :  { %v99_v43 = vadd.f32 %v93_v41, %v81_v38  ;;  %v100_v44 = vadd.f32 %v93_v41, %v82_v39  ;;  %v95_v45 = vadd.f32 %v85_v42, %v77_v40  ;;  %v96_v48 = vadd.f32 %v85_v42, %v78_v47 }
  0x88   :  { %v877_v38 = vmov 5  }
  0x89   :  { %824 = vtanh.f32 %v99_v43  ;;  %817 = vset.pattern.permute.xlu0 %v877_v38 }
  0x8a   :  { %826 = vtanh.f32 %v100_v44  ;;  %v823_v49 = vpop.eup %822  ;;  %624 = vperm.xlu0 %817, %v908_v3  }
  0x8b   :  { %828 = vtanh.f32 %v95_v45  ;;  %v108_v50 = vmul.f32 %v823_v49, %v823_v49  ;;  %v132_v2 = vmul.f32 -2.0, %v823_v49 }
  0x8c   :  { %830 = vtanh.f32 %v98_v46  ;;  %v998_v46 = vld [vmem:[%s1065_s1 + $0x18] sm:$0xff]  ;;  %818 = vset.pattern.permute.xlu1 %v877_v38  ;;  %548 = vperm.xlu2 %815, %v898_v0  }
  0x8d   :  { %832 = vtanh.f32 %v96_v48  ;;  %v111_v59 = vsub.f32 1.0, %v108_v50  ;;  %628 = vperm.xlu1 %818, %v903_v1   ;;  %v23_v1 = vld [vmem:[%s1065_s1 + $0x20] sm:$0xff] }
  0x8f   :  { %v825_v51 = vpop.eup %824  ;;  %v153_v52 = vpop.permute.xlu1 %152  ;;  %v135_v12 = vmul.f32 %v132_v2, %v111_v59  ;;  %v126_v15 = vmul.f32 %v111_v59, %v941_v18  ;;  %v878_v2 = vmov 6  }
  0x90   :  { %v827_v53 = vpop.eup %826  ;;  %v109_v54 = vmul.f32 %v825_v51, %v825_v51  ;;  %199 = vmatpush.msra.mxu0 %v825_v51  ;;  %783 = vmatpush.msra.mxu2 %v825_v51  ;;  %v133_v58 = vmul.f32 -2.0, %v825_v51  ;;  %v322_v24 = vpop.permute.xlu0 %321 }
  0x91   :  { %v829_v55 = vpop.eup %828  ;;  %225 = vmatpush.msra.mxu1 %v827_v53  ;;  %786 = vmatpush.msra.mxu3 %v827_v53  ;;  %v156_v21 = vmul.f32 %v148_v14, %v135_v12 }
  0x92   :  { %v831_v56 = vpop.eup %830  ;;  %v112_v57 = vsub.f32 1.0, %v109_v54  ;;  %200 = vmatpush.msra.mxu0 %v823_v49  ;;  %784 = vmatpush.msra.mxu2 %v823_v49  ;;  %v107_v60 = vmul.f32 %v829_v55, %v829_v55  ;;  %v131_v16 = vmul.f32 -2.0, %v829_v55 }
  0x93   :  { %226 = vmatpush.msra.mxu1 %v831_v56  ;;  %787 = vmatpush.msra.mxu3 %v831_v56  ;;  %v833_v62 = vpop.eup %832 }
  0x94   :  { %v136_v63 = vmul.f32 %v133_v58, %v112_v57  ;;  %201 = vmatpush.msra.mxu0 %v829_v55  ;;  %785 = vmatpush.msra.mxu2 %v829_v55  ;;  %v121_v4 = vmul.f32 %v112_v57, %v929_v11  ;;  %v127_v5 = vmul.f32 %v112_v57, %v939_v17  ;;  %v110_v6 = vsub.f32 1.0, %v107_v60 }
  0x95   :  { %227 = vmatpush.msra.mxu1 %v833_v62  ;;  %788 = vmatpush.msra.mxu3 %v833_v62  ;;  %v120_v11 = vmul.f32 %v111_v59, %v927_v10  ;;  %v21_v10 = vld [vmem:[%s1065_s1 + $0x10] sm:$0xff] }
  0x96   :  { %v157_v8 = vmul.f32 %v153_v52, %v136_v63  ;;  %754 = vmatmul.msk.f32.vlgmr.msra.gmra.mxu2 %vm176_vm0, %v20_v61  ;;  %757 = vmatmul.msk.f32.vlgmr.msra.gmra.mxu3 %vm176_vm0, %v20_v61  ;;  %v119_v19 = vmul.f32 %v110_v6, %v925_v9  ;;  %v125_v20 = vmul.f32 %v110_v6, %v934_v13 }
  0x97   :  { %251 = vmatpush.msrb.mxu2 %v121_v4  ;;  %277 = vmatpush.msrb.mxu3 %v127_v5  ;;  %v143_v17 = vpop.permute.xlu1 %142  ;;  %v134_v22 = vmul.f32 %v131_v16, %v110_v6 }
  0x98   :  { %753 = vmatmul.msk.f32.vlgmr.msra.gmra.mxu0 %vm176_vm0, %v19_v7  ;;  %756 = vmatmul.msk.f32.vlgmr.msra.gmra.mxu1 %vm176_vm0, %v19_v7 }
  0x99   :  { %252 = vmatpush.msrb.mxu2 %v120_v11  ;;  %278 = vmatpush.msrb.mxu3 %v126_v15  ;;  %v155_v18 = vmul.f32 %v143_v17, %v134_v22 }
  0x9a   :  { %303 = vmatpush.msrb.mxu0 %v157_v8  ;;  %820 = vset.pattern.permute.xlu1 %v878_v2 }
  0x9b   :  { %253 = vmatpush.msrb.mxu2 %v119_v19  ;;  %279 = vmatpush.msrb.mxu3 %v125_v20  ;;  %v24_v20 = vld [vmem:[%s1065_s1 + $0x28] sm:$0xff] }
  0x9c   :  { %304 = vmatpush.msrb.mxu0 %v156_v21  ;;  %691 = vperm.xlu1 %820, %v908_v3  }
  0x9d   :  { %819 = vset.pattern.permute.xlu2 %v877_v38  ;;  %821 = vset.pattern.permute.xlu0 %v878_v2 }
  0x9e   :  { %305 = vmatpush.msrb.mxu0 %v155_v18  ;;  %755 = vmatmul.msk.f32.gmra.mxu2 %vm176_vm0, %v21_v10 }
  0x9f   :  { %758 = vmatmul.msk.f32.gmra.mxu3 %vm176_vm0, %v21_v10  ;;  %632 = vperm.xlu2 %819, %v898_v0  }
  0xa0   :  { %765 = vmatmul.msk.f32.vlgmr.msrb.gmra.mxu0 %vm176_vm0, %v19_v7  ;;  %v318_v28 = vpop.permute.xlu1 %317 }
  0xa6   :  { %759 = vmatmul.msk.f32.vlgmr.msrb.gmra.mxu2 %vm176_vm0, %v19_v7 }
  0xa7   :  { %762 = vmatmul.msk.f32.vlgmr.msrb.gmra.mxu3 %vm176_vm0, %v19_v7 }
  0xa8   :  { %766 = vmatmul.msk.f32.gmra.mxu0 %vm176_vm0, %v20_v61 }
  0xae   :  { %760 = vmatmul.msk.f32.gmra.mxu2 %vm176_vm0, %v20_v61 }
  0xaf   :  { %763 = vmatmul.msk.f32.gmra.mxu3 %vm176_vm0, %v20_v61 }
  0xb0   :  { %767 = vmatmul.msk.f32.gmra.mxu0 %vm176_vm0, %v21_v10 }
  0xb6   :  { %761 = vmatmul.msk.f32.gmra.mxu2 %vm176_vm0, %v21_v10 }
  0xb7   :  { %764 = vmatmul.msk.f32.gmra.mxu3 %vm176_vm0, %v21_v10 }
 0x115   :  { %v203_v23 = vpop.f32.mrf.mxu0  ;;  %v229_v27 = vpop.f32.mrf.mxu1 }
 0x116   :  { %v329_v34 = vadd.f32 %v318_v28, %v229_v27  ;;  %v328_v35 = vadd.f32 %v318_v28, %v203_v23 }
 0x119   :  { %v206_v9 = vpop.f32.mrf.mxu2  ;;  %v232_v13 = vpop.f32.mrf.mxu3 }
 0x11a   :  { %v331_v25 = vadd.f32 %v322_v24, %v232_v13  ;;  %v330_v30 = vadd.f32 %v322_v24, %v206_v9  ;;  %v541_v24 = vpop.permute.xlu2 %540 }
 0x11c   :  { %834 = vtanh.f32 %v331_v25 }
 0x11d   :  { %v988_v36 = vpop.f32.mrf.mxu0 }
 0x121   :  { %v209_v29 = vpop.f32.mrf.mxu2 }
 0x122   :  { %v332_v31 = vadd.f32 %v326_v26, %v209_v29  ;;  %v235_v32 = vpop.f32.mrf.mxu3  ;;  %v835_v39 = vpop.eup %834 }
 0x123   :  { %v333_v33 = vadd.f32 %v326_v26, %v235_v32  ;;  %v545_v26 = vpop.permute.xlu1 %544 }
 0x124   :  { %836 = vtanh.f32 %v332_v31 }
 0x125   :  { %838 = vtanh.f32 %v333_v33  ;;  %v310_v48 = vpop.f32.mrf.mxu0 }
 0x126   :  { %840 = vtanh.f32 %v330_v30  ;;  %v549_v30 = vpop.permute.xlu2 %548 }
 0x127   :  { %842 = vtanh.f32 %v329_v34 }
 0x128   :  { %844 = vtanh.f32 %v328_v35 }
 0x129   :  { %v255_v40 = vpop.f32.mrf.mxu2 }
 0x12a   :  { %v837_v41 = vpop.eup %836  ;;  %v993_v42 = vpop.f32.mrf.mxu3  ;;  %v373_v8 = vmul.f32 %v255_v40, %v255_v40 }
 0x12b   :  { %v839_v43 = vpop.eup %838  ;;  %422 = vmatpush.msrb.mxu1 %v837_v41  ;;  %v342_v51 = vmul.f32 %v837_v41, %v837_v41  ;;  %v369_v58 = vmul.f32 2.0, %v837_v41  ;;  %v1032_v38 = vpop.permute.xlu1 %628 }
 0x12c   :  { %v841_v44 = vpop.eup %840  ;;  %448 = vmatpush.msra.mxu2 %v839_v43 }
 0x12d   :  { %v843_v45 = vpop.eup %842  ;;  %423 = vmatpush.msrb.mxu1 %v841_v44  ;;  %v341_v53 = vmul.f32 %v841_v44, %v841_v44  ;;  %v345_v56 = vsub.f32 1.0, %v342_v51  ;;  %v313_v60 = vpop.f32.mrf.mxu0  ;;  %v368_v61 = vmul.f32 2.0, %v841_v44 }
 0x12e   :  { %v845_v47 = vpop.eup %844  ;;  %449 = vmatpush.msra.mxu2 %v835_v39 }
 0x12f   :  { %424 = vmatpush.msrb.mxu1 %v845_v47  ;;  %v340_v49 = vmul.f32 %v845_v47, %v845_v47  ;;  %v367_v55 = vmul.f32 2.0, %v845_v47  ;;  %v344_v57 = vsub.f32 1.0, %v341_v53  ;;  %v372_v5 = vmul.f32 %v369_v58, %v345_v56 }
 0x130   :  { %768 = vmatmul.msk.f32.vlgmr.msrb.gmra.mxu1 %vm176_vm0, %v998_v46  ;;  %450 = vmatpush.msra.mxu2 %v843_v45  ;;  %v366_v11 = vmul.f32 %v345_v56, %v313_v60 }
 0x131   :  { %v258_v50 = vpop.f32.mrf.mxu2  ;;  %771 = vmatmul.msk.f32.vlgmr.msra.gmra.mxu2 %vm176_vm0, %v998_v46  ;;  %v343_v54 = vsub.f32 1.0, %v340_v49  ;;  %v371_v12 = vmul.f32 %v368_v61, %v344_v57  ;;  %v365_v10 = vmul.f32 %v344_v57, %v310_v48 }
 0x132   :  { %v284_v52 = vpop.f32.mrf.mxu3  ;;  %v374_v62 = vmul.f32 %v258_v50, %v258_v50  ;;  %v353_v15 = vmul.f32 %v344_v57, %v258_v50 }
 0x133   :  { %v370_v59 = vmul.f32 %v367_v55, %v343_v54  ;;  %v359_v19 = vmul.f32 %v344_v57, %v284_v52  ;;  %v352_v21 = vmul.f32 %v343_v54, %v255_v40  ;;  %v364_v22 = vmul.f32 %v343_v54, %v988_v36  ;;  %v1034_v40 = vpop.permute.xlu0 %624 }
 0x134   :  { %v377_v17 = vmul.f32 %v374_v62, %v371_v12  ;;  %v358_v0 = vmul.f32 %v343_v54, %v993_v42  ;;  %v1037_v42 = vpop.permute.xlu2 %632 }
 0x135   :  { %v376_v18 = vmul.f32 %v373_v8, %v370_v59 }
 0x136   :  { %v380_v9 = vsub.f32 %v365_v10, %v377_v17 }
 0x137   :  { %v379_v13 = vsub.f32 %v364_v22, %v376_v18 }
 0x138   :  { %769 = vmatmul.msk.f32.gmra.mxu1 %vm176_vm0, %v23_v1 }
 0x139   :  { %v261_v63 = vpop.f32.mrf.mxu2  ;;  %772 = vmatmul.msk.f32.gmra.mxu2 %vm176_vm0, %v23_v1 }
 0x13a   :  { %v354_v4 = vmul.f32 %v345_v56, %v261_v63  ;;  %v375_v6 = vmul.f32 %v261_v63, %v261_v63  ;;  %v287_v7 = vpop.f32.mrf.mxu3 }
 0x13b   :  { %v360_v14 = vmul.f32 %v345_v56, %v287_v7 }
 0x13c   :  { %v378_v16 = vmul.f32 %v375_v6, %v372_v5  ;;  %474 = vmatpush.msra.mxu3 %v354_v4 }
 0x13d   :  { %500 = vmatpush.msra.mxu0 %v360_v14 }
 0x13e   :  { %v381_v3 = vsub.f32 %v366_v11, %v378_v16  ;;  %475 = vmatpush.msra.mxu3 %v353_v15 }
 0x13f   :  { %501 = vmatpush.msra.mxu0 %v359_v19 }
 0x140   :  { %770 = vmatmul.msk.f32.gmra.mxu1 %vm176_vm0, %v24_v20  ;;  %476 = vmatpush.msra.mxu3 %v352_v21 }
 0x141   :  { %502 = vmatpush.msra.mxu0 %v358_v0  ;;  %526 = vmatpush.msra.mxu1 %v381_v3 }
 0x142   :  { %774 = vmatmul.msk.f32.vlgmr.msra.gmra.mxu3 %vm176_vm0, %v998_v46  ;;  %777 = vmatmul.msk.f32.vlgmr.msra.gmra.mxu0 %vm176_vm0, %v998_v46 }
 0x143   :  { %527 = vmatpush.msra.mxu1 %v380_v9  ;;  %773 = vmatmul.msk.f32.gmra.mxu2 %vm176_vm0, %v24_v20 }
 0x145   :  { %528 = vmatpush.msra.mxu1 %v379_v13 }
 0x148   :  { %780 = vmatmul.msk.f32.vlgmr.msra.gmra.mxu1 %vm176_vm0, %v998_v46 }
 0x14a   :  { %775 = vmatmul.msk.f32.gmra.mxu3 %vm176_vm0, %v23_v1  ;;  %778 = vmatmul.msk.f32.gmra.mxu0 %vm176_vm0, %v23_v1 }
 0x150   :  { %781 = vmatmul.msk.f32.gmra.mxu1 %vm176_vm0, %v23_v1 }
 0x152   :  { %776 = vmatmul.msk.f32.gmra.mxu3 %vm176_vm0, %v24_v20  ;;  %779 = vmatmul.msk.f32.gmra.mxu0 %vm176_vm0, %v24_v20 }
 0x158   :  { %782 = vmatmul.msk.f32.gmra.mxu1 %vm176_vm0, %v24_v20 }
 0x1ad   :  { %v426_v23 = vpop.f32.mrf.mxu1 }
 0x1ae   :  { %v551_v29 = vadd.f32 %v541_v24, %v426_v23 }
 0x1b4   :  { %v452_v25 = vpop.f32.mrf.mxu2 }
 0x1b5   :  { %v429_v27 = vpop.f32.mrf.mxu1  ;;  %v552_v32 = vadd.f32 %v541_v24, %v452_v25 }
 0x1b6   :  { %v553_v28 = vadd.f32 %v545_v26, %v429_v27 }
 0x1b8   :  { %846 = vtanh.f32 %v553_v28 }
 0x1b9   :  { %848 = vtanh.f32 %v551_v29 }
 0x1bc   :  { %v455_v31 = vpop.f32.mrf.mxu2 }
 0x1bd   :  { %v432_v33 = vpop.f32.mrf.mxu1  ;;  %v554_v35 = vadd.f32 %v545_v26, %v455_v31 }
 0x1be   :  { %v555_v34 = vadd.f32 %v549_v30, %v432_v33  ;;  %v847_v37 = vpop.eup %846 }
 0x1bf   :  { %v504_v36 = vpop.f32.mrf.mxu0  ;;  %v849_v39 = vpop.eup %848  ;;  %v640_v41 = vmul.f32 %v847_v37, %v1032_v38  ;;  %v564_v43 = vmul.f32 %v847_v37, %v847_v37  ;;  %v591_v57 = vmul.f32 2.0, %v847_v37 }
 0x1c0   :  { %850 = vtanh.f32 %v555_v34  ;;  %v563_v44 = vmul.f32 %v849_v39, %v849_v39  ;;  %v635_v48 = vmul.f32 %v849_v39, %v1034_v40  ;;  %v590_v2 = vmul.f32 2.0, %v849_v39 }
 0x1c1   :  { %852 = vtanh.f32 %v552_v32  ;;  %v567_v55 = vsub.f32 1.0, %v564_v43 }
 0x1c2   :  { %854 = vtanh.f32 %v554_v35  ;;  %v650_v1 = vadd.f32 %v640_v41, %v635_v48  ;;  %v566_v56 = vsub.f32 1.0, %v563_v44 }
 0x1c3   :  { %v594_v6 = vmul.f32 %v591_v57, %v567_v55 }
 0x1c4   :  { %v581_v61 = vmul.f32 %v566_v56, %v504_v36  ;;  %v593_v16 = vmul.f32 %v590_v2, %v566_v56 }
 0x1c5   :  { %v478_v45 = vpop.f32.mrf.mxu3  ;;  %v530_v46 = vpop.f32.mrf.mxu1 }
 0x1c6   :  { %v851_v47 = vpop.eup %850  ;;  %v458_v49 = vpop.f32.mrf.mxu2  ;;  %v596_v4 = vmul.f32 %v478_v45, %v478_v45  ;;  %v638_v17 = vmul.f32 %v1034_v40, %v581_v61  ;;  %v575_v0 = vmul.f32 %v566_v56, %v478_v45  ;;  %v587_v13 = vmul.f32 %v566_v56, %v530_v46 }
 0x1c7   :  { %v853_v50 = vpop.eup %852  ;;  %v645_v51 = vmul.f32 %v851_v47, %v1037_v42  ;;  %v556_v52 = vadd.f32 %v549_v30, %v458_v49  ;;  %v507_v53 = vpop.f32.mrf.mxu0  ;;  %v565_v59 = vmul.f32 %v851_v47, %v851_v47  ;;  %v592_v23 = vmul.f32 2.0, %v851_v47 }
 0x1c8   :  { %v855_v54 = vpop.eup %854  ;;  %v582_v58 = vmul.f32 %v567_v55, %v507_v53  ;;  %v636_v62 = vmul.f32 %v853_v50, %v1034_v40  ;;  %v599_v9 = vmul.f32 %v596_v4, %v593_v16  ;;  %v637_v32 = vmul.f32 %v1034_v40, %v575_v0 }
 0x1c9   :  { %856 = vtanh.f32 %v556_v52  ;;  %v651_v60 = vadd.f32 %v650_v1, %v645_v51  ;;  %v641_v63 = vmul.f32 %v855_v54, %v1032_v38  ;;  %v568_v14 = vsub.f32 1.0, %v565_v59 }
 0x1ca   :  { %v643_v8 = vmul.f32 %v1032_v38, %v582_v58  ;;  %v602_v33 = vsub.f32 %v587_v13, %v599_v9  ;;  %v751_v58 = vld [vmem:[%s1064_s0 + $0x2] ss:$8 sm:$0x3] }
 0x1cb   :  { %v652_v11 = vrot.slane %v651_v60, 4  ;;  %v658_v21 = vadd.f32 %v641_v63, %v636_v62  ;;  %v595_v35 = vmul.f32 %v592_v23, %v568_v14  ;;  %v702_v4 = vperm.slane %v751_v58, 1 }
 0x1cc   :  { %v674_v24 = vadd.f32 %v643_v8, %v638_v17  ;;  %v639_v50 = vmul.f32 %v1034_v40, %v602_v33  ;;  %v752_v40 = vld [vmem:[%s1064_s0 + $0x3] ss:$8 sm:$0x3] }
 0x1cd   :  { %v481_v5 = vpop.f32.mrf.mxu3  ;;  %v533_v7 = vpop.f32.mrf.mxu1  ;;  %v653_v26 = vadd.f32 %v652_v11, %v651_v60 }
 0x1ce   :  { %v597_v12 = vmul.f32 %v481_v5, %v481_v5  ;;  %v576_v19 = vmul.f32 %v567_v55, %v481_v5  ;;  %v588_v18 = vmul.f32 %v567_v55, %v533_v7  ;;  %v692_v5 = vpop.permute.xlu1 %691 }
 0x1cf   :  { %v857_v15 = vpop.eup %856  ;;  %v510_v20 = vpop.f32.mrf.mxu0  ;;  %v654_v43 = vrot.slane %v653_v26, 2 }
 0x1d0   :  { %v646_v3 = vmul.f32 %v857_v15, %v1037_v42  ;;  %v600_v22 = vmul.f32 %v597_v12, %v594_v6  ;;  %v583_v10 = vmul.f32 %v568_v14, %v510_v20  ;;  %v642_v28 = vmul.f32 %v1032_v38, %v576_v19 }
 0x1d1   :  { %v655_v54 = vadd.f32 %v654_v43, %v653_v26  ;;  %v706_v12 = vperm.slane %v752_v40, 1 }
 0x1d2   :  { %v648_v25 = vmul.f32 %v1037_v42, %v583_v10  ;;  %v659_v27 = vadd.f32 %v658_v21, %v646_v3  ;;  %v603_v30 = vsub.f32 %v588_v18, %v600_v22  ;;  %v666_v46 = vadd.f32 %v642_v28, %v637_v32 }
 0x1d3   :  { %v656_v62 = vrot.slane %v655_v54, 1 }
 0x1d4   :  { %v675_v29 = vadd.f32 %v674_v24, %v648_v25  ;;  %v660_v31 = vrot.slane %v659_v27, 4  ;;  %v644_v47 = vmul.f32 %v1032_v38, %v603_v30 }
 0x1d5   :  { %v484_v34 = vpop.f32.mrf.mxu3  ;;  %v536_v36 = vpop.f32.mrf.mxu1 }
 0x1d6   :  { %v676_v37 = vrot.slane %v675_v29, 4  ;;  %v577_v39 = vmul.f32 %v568_v14, %v484_v34  ;;  %v598_v41 = vmul.f32 %v484_v34, %v484_v34  ;;  %v661_v44 = vadd.f32 %v660_v31, %v659_v27 }
 0x1d7   :  { %v589_v45 = vmul.f32 %v568_v14, %v536_v36  ;;  %v682_v56 = vadd.f32 %v644_v47, %v639_v50  ;;  %v657_v14 = vadd.f32 %v656_v62, %v655_v54 }
 0x1d8   :  { %v601_v48 = vmul.f32 %v598_v41, %v595_v35  ;;  %v647_v49 = vmul.f32 %v1037_v42, %v577_v39  ;;  %v662_v51 = vrot.slane %v661_v44, 2  ;;  %v677_v52 = vadd.f32 %v676_v37, %v675_v29 }
 0x1d9   :  { %v694_v22 = vadd.f32 %v692_v5, %v657_v14 }
 0x1da   :  { %v667_v53 = vadd.f32 %v666_v46, %v647_v49  ;;  %v604_v55 = vsub.f32 %v589_v45, %v601_v48  ;;  %v663_v1 = vadd.f32 %v662_v51, %v661_v44  ;;  %v678_v60 = vrot.slane %v677_v52, 2 }
 0x1dc   :  { %v668_v57 = vrot.slane %v667_v53, 4  ;;  %v649_v59 = vmul.f32 %v1037_v42, %v604_v55  ;;  %v664_v38 = vrot.slane %v663_v1, 1  ;;  %v679_v15 = vadd.f32 %v678_v60, %v677_v52 }
 0x1de   :  { %v669_v61 = vadd.f32 %v668_v57, %v667_v53  ;;  %v683_v63 = vadd.f32 %v682_v56, %v649_v59  ;;  %v665_v2 = vadd.f32 %v664_v38, %v663_v1  ;;  %v680_v3 = vrot.slane %v679_v15, 1 }
 0x1e0   :  { %v670_v6 = vrot.slane %v669_v61, 2  ;;  %v684_v7 = vrot.slane %v683_v63, 4  ;;  %v695_v8 = vadd.f32 %v692_v5, %v665_v2  ;;  %v681_v23 = vadd.f32 %v680_v3, %v679_v15 }
 0x1e2   :  { %v671_v11 = vadd.f32 %v670_v6, %v669_v61  ;;  %v685_v42 = vadd.f32 %v684_v7, %v683_v63  ;;  %v704_v16 = vsub.f32 %v695_v8, %v702_v4 }
 0x1e4   :  { %v672_v17 = vrot.slane %v671_v11, 1  ;;  %v686_v19 = vrot.slane %v685_v42, 2  ;;  %v708_v20 = vmul.f32 %v706_v12, %v704_v16 }
 0x1e6   :  { %v673_v21 = vadd.f32 %v672_v17, %v671_v11  ;;  %v687_v10 = vadd.f32 %v686_v19, %v685_v42  ;;  %v721_v18 = vmul.f32 %v708_v20, %v708_v20 }
 0x1e8   :  { %v696_v0 = vmul.f32 %v694_v22, %v673_v21  ;;  %v688_v9 = vrot.slane %v687_v10, 1  ;;  %v722_v13 = vsel %vm710_vm1, %v721_v18, 0.0 }
 0x1e9   :  { %723 = vadd.xlane.f32.xlu0 %v722_v13 }
 0x1ea   :  { %v689_v24 = vadd.f32 %v688_v9, %v687_v10  ;;  %v697_v25 = vadd.f32 %v696_v0, %v681_v23 }
 0x1ec   :  { %v698_v26 = vmul.f32 0.003183099, %v689_v24 }
 0x1ee   :  { %v699_v27 = vsub.f32 %v697_v25, %v698_v26 }
 0x1f0   :  { %v700_v28 = vmul.f32 %v752_v40, %v699_v27 }
 0x1f2   :  { %v709_v29 = vmul.f32 %v700_v28, %v700_v28 }
 0x1f4   :  { %v711_v30 = vsel %vm710_vm1, %v709_v29, 0.0 }
 0x1f5   :  { %712 = vadd.xlane.f32.xlu2 %v711_v30 }
 0x25c   :  { %v724_v31 = vpop.xlane.xlu0 %723 }
 0x25d   :  { %v725_v32 = vrot.slane %v724_v31, 4 }
 0x25f   :  { %v726_v33 = vadd.f32 %v725_v32, %v724_v31 }
 0x261   :  { %v727_v34 = vrot.slane %v726_v33, 2 }
 0x263   :  { %v728_v39 = vadd.f32 %v727_v34, %v726_v33 }
 0x265   :  { %v729_v44 = vrot.slane %v728_v39, 1 }
 0x267   :  { %v730_v47 = vadd.f32 %v729_v44, %v728_v39 }
 0x268   :  { %v713_v35 = vpop.xlane.xlu2 %712 }
 0x269   :  { %v714_v36 = vrot.slane %v713_v35, 4 }
 0x26b   :  { %v715_v37 = vadd.f32 %v714_v36, %v713_v35 }
 0x26d   :  { %v716_v41 = vrot.slane %v715_v37, 2 }
 0x26f   :  { %v717_v43 = vadd.f32 %v716_v41, %v715_v37 }
 0x271   :  { %v718_v45 = vrot.slane %v717_v43, 1 }
 0x273   :  { %v719_v46 = vadd.f32 %v718_v45, %v717_v43 }
 0x275   :  { %789 = vpush %v719_v46 }
 0x276   :  { %791 = vpush %v730_v47 }
 0x2a6   :  { %s790_s8 = spop %789 }
 0x2a7   :  { %s792_s9 = spop %791 }
 0x2a8   :  { %s732_s10 = sadd.f32 %s792_s9, %s790_s8 }
 0x2aa   :  { %734 = sst [smem:[#allocation3]] %s732_s10 }
 0x2ab   :  { %743 = dma.smem_to_hbm %s879_s11, 16, %s741_s7, [#allocation4]  }
 0x2ac   :  { %870 = dma.done.wait [#allocation4], 16  }
 0x2ad   :  { %871 = vsyncadd [#allocation4], 4294967280 }
 0x2ae   :  { %748 = sfence }
 0x2af   :  { %749 = vsyncpa [#allocation4], 1 }

</bundles_post_ra>
